<compile_context>
chip_gen: v6e
topology: v6e:2x2x1
jax: 0.10.0
libtpu: 0.0.40
codegen_flags: <defaults>
</compile_context>

<pallas_src>
import math

import jax
import jax.numpy as jnp
from jax import lax
from jax.experimental import pallas as pl
from jax.experimental.pallas import tpu as pltpu


def _make_mcw_kernel(*, T, Tc, Bt, P, dim_x, H, n_periods, unroll_periods,
                     need_guard):
    """Fused clockwork-RNN recurrence + per-head MLP, one time chunk per grid step.

    Kernel refs:
      x_ref   : (Tc*Bt, dim_x)   masked inputs for this (batch tile, time chunk),
                                 rows ordered j*Bt + b (time-major within chunk)
      upd_ref : (P, 1, H)        periodic group-update mask table, H = dim_y*dim_h1
      wx_ref  : (dim_x, H)       per-head w_x stacked along lanes
      wh_ref  : (H, H)           block-diagonal per-head w_h
      b_ref   : (1, H)           recurrent bias
      w1_ref  : (H, dim_y*dim_h2)   block-diagonal MLP layer-1 weights
      b1_ref  : (1, dim_y*dim_h2)
      w2_ref  : (dim_y*dim_h2, dim_y) block-structured MLP layer-2 weights
      b2_ref  : (1, dim_y)
      o_ref   : (Bt, dim_y)      output (written only at the last time chunk)
      h_ref   : (Bt, H)          VMEM scratch: hidden state carried across chunks
      xp_ref  : (Tc*Bt, H)       VMEM scratch: hoisted input projection (+bias)
    """

    def kernel(x_ref, upd_ref, wx_ref, wh_ref, b_ref,
               w1_ref, b1_ref, w2_ref, b2_ref, o_ref, h_ref, xp_ref):
        ti = pl.program_id(1)

        # ---- init hidden state at the first time chunk of every batch tile ----
        @pl.when(ti == 0)
        def _init():
            h_ref[...] = jnp.zeros_like(h_ref)

        # ---- hoisted input projection: ONE MXU matmul per chunk (bias folded) --
        xp_ref[...] = (
            jnp.dot(x_ref[...], wx_ref[...], preferred_element_type=jnp.float32)
            + b_ref[...])

        wh = wh_ref[...]
        base = ti * Tc

        # Clock-mask period table; hoist rows to registers when the period is tiny.
        masks = [upd_ref[u] for u in range(P)] if P <= 8 else None

        def period_body(i, h):
            # Static inner unroll over one clock period -> static mask indices.
            for u in range(P):
                m = masks[u] if masks is not None else upd_ref[u]      # (1, H)
                if need_guard:
                    # Zero the update for zero-padded trailing timesteps.
                    valid = ((base + i * P + u) < T).astype(jnp.float32)
                    m = m * valid
                row = pl.multiple_of((i * P + u) * Bt, Bt)
                pre = xp_ref[pl.ds(row, Bt), :] + jnp.dot(
                    h, wh, preferred_element_type=jnp.float32)         # (Bt, H)
                cand = jnp.tanh(pre)
                h = h + m * (cand - h)                                 # gated update
            return h

        h = lax.fori_loop(0, n_periods, period_body, h_ref[...],
                          unroll=unroll_periods)
        h_ref[...] = h

        # ---- per-head MLP head, fused via block-diagonal weights; last chunk ---
        @pl.when(ti == pl.num_programs(1) - 1)
        def _finalize():
            z = jnp.maximum(
                jnp.dot(h, w1_ref[...], preferred_element_type=jnp.float32)
                + b1_ref[...], 0.0)                                    # (Bt, dim_y*dim_h2)
            y = jnp.dot(z, w2_ref[...],
                        preferred_element_type=jnp.float32) + b2_ref[...]
            o_ref[...] = y.astype(o_ref.dtype)                         # (Bt, dim_y)

    return kernel


def mcw_rnn_forward(x, params, *, n1, n2, n3, multiplier, x2_rate, x3_rate,
                    time_chunk=128):
    """x: (B, T, dim_x) float32. Returns (B, dim_y) float32 (mode='slowest')."""
    w_x, w_h, b, w1, b1, w2, b2 = params
    dim_y, dim_x, dim_h1 = w_x.shape
    dim_h2 = w1.shape[2]
    B, T, _ = x.shape
    H = dim_y * dim_h1
    HY2 = dim_y * dim_h2

    # ---- fused weights (layout plumbing; no cross-head coupling) -------------
    wx_flat = jnp.transpose(w_x, (1, 0, 2)).reshape(dim_x, H)
    wh_bd = jax.scipy.linalg.block_diag(*[w_h[i] for i in range(dim_y)])
    w1_bd = jax.scipy.linalg.block_diag(*[w1[i] for i in range(dim_y)])
    w2_sel = jax.scipy.linalg.block_diag(*[w2[i][:, None] for i in range(dim_y)])
    b_flat = b.reshape(1, H)
    b1_flat = b1.reshape(1, HY2)
    b2_flat = b2.reshape(1, dim_y)

    d1, d2, d3 = n1 * multiplier, n2 * multiplier, n3 * multiplier

    # ---- per-timestep input-feature mask (== the torch x / w_x row slicing) ---
    t = jnp.arange(T) + 1
    u2 = ((t % x2_rate) == 0).astype(jnp.float32)
    u3 = u2 * ((t % x3_rate) == 0).astype(jnp.float32)   # nested inside x2 branch
    in_mask = jnp.concatenate(
        [jnp.ones((T, n1), jnp.float32),
         jnp.repeat(u2[:, None], n2, axis=1),
         jnp.repeat(u3[:, None], n3, axis=1)], axis=1)                 # (T, dim_x)

    # ---- periodic group-update mask table (period P = lcm of clock rates) -----
    P = x2_rate * x3_rate // math.gcd(x2_rate, x3_rate)
    tp = jnp.arange(P) + 1
    p2 = ((tp % x2_rate) == 0).astype(jnp.float32)
    p3 = p2 * ((tp % x3_rate) == 0).astype(jnp.float32)
    grp = jnp.concatenate(
        [jnp.ones((P, d1), jnp.float32),
         jnp.repeat(p2[:, None], d2, axis=1),
         jnp.repeat(p3[:, None], d3, axis=1)], axis=1)                 # (P, dim_h1)
    upd_tab = jnp.tile(grp, (1, dim_y)).reshape(P, 1, H)               # (P, 1, H)

    # ---- tiling: batch tiles (parallel) x time chunks (arbitrary, carries h) --
    Bt = ((B + 7) // 8) * 8 if B <= 128 else 128       # sublane-aligned batch tile
    B_pad = ((B + Bt - 1) // Bt) * Bt
    nb = B_pad // Bt

    Tc_cap = max(P, (max(time_chunk, P) // P) * P)      # chunk length, multiple of P
    T_ceil = ((T + P - 1) // P) * P
    Tc = min(Tc_cap, T_ceil)
    T_pad = ((T + Tc - 1) // Tc) * Tc
    nt = T_pad // Tc
    n_periods = Tc // P
    unroll_periods = max(1, min(n_periods, max(1, 8 // P)))
    need_guard = (T_pad != T)

    # Fold the input mask into x (replaces the torch slicing), pad, and lay out
    # as (nb, T_pad*Bt, dim_x) so each grid block is a lane-dense matmul LHS.
    x_m = x * in_mask[None, :, :]                                      # (B, T, dim_x)
    x_m = jnp.pad(x_m, ((0, B_pad - B), (0, T_pad - T), (0, 0)))
    x_g = x_m.reshape(nb, Bt, T_pad, dim_x).transpose(0, 2, 1, 3)      # (nb,T,Bt,dx)
    x_g = x_g.reshape(nb, T_pad * Bt, dim_x)

    kernel = _make_mcw_kernel(T=T, Tc=Tc, Bt=Bt, P=P, dim_x=dim_x, H=H,
                              n_periods=n_periods,
                              unroll_periods=unroll_periods,
                              need_guard=need_guard)

    out = pl.pallas_call(
        kernel,
        out_shape=jax.ShapeDtypeStruct((B_pad, dim_y), jnp.float32),
        grid_spec=pltpu.PrefetchScalarGridSpec(
            num_scalar_prefetch=0,
            grid=(nb, nt),
            in_specs=[
                pl.BlockSpec((None, Tc * Bt, dim_x),
                             lambda bi, ti: (bi, ti, 0)),              # x chunk
                pl.BlockSpec((P, 1, H), lambda bi, ti: (0, 0, 0)),     # clock table
                pl.BlockSpec((dim_x, H), lambda bi, ti: (0, 0)),       # wx (stacked)
                pl.BlockSpec((H, H), lambda bi, ti: (0, 0)),           # wh (block-diag)
                pl.BlockSpec((1, H), lambda bi, ti: (0, 0)),           # b
                pl.BlockSpec((H, HY2), lambda bi, ti: (0, 0)),         # mlp w1
                pl.BlockSpec((1, HY2), lambda bi, ti: (0, 0)),         # mlp b1
                pl.BlockSpec((HY2, dim_y), lambda bi, ti: (0, 0)),     # mlp w2
                pl.BlockSpec((1, dim_y), lambda bi, ti: (0, 0)),       # mlp b2
            ],
            out_specs=pl.BlockSpec((Bt, dim_y), lambda bi, ti: (bi, 0)),
            scratch_shapes=[
                pltpu.VMEM((Bt, H), jnp.float32),        # carried hidden state
                pltpu.VMEM((Tc * Bt, H), jnp.float32),   # hoisted input projection
            ]),
        compiler_params=pltpu.CompilerParams(
            dimension_semantics=("parallel", "arbitrary")),
    )(x_g, upd_tab, wx_flat, wh_bd, b_flat, w1_bd, b1_flat, w2_sel, b2_flat)

    return out[:B]                                                     # (B, dim_y)


def init_params(key, n1, n2, n3, multiplier, dim_h, dim_y):
    """Deterministic per-head parameters (PyTorch-style uniform init)."""
    dim_x = n1 + n2 + n3
    dim_h1 = dim_x * multiplier
    dim_h2 = dim_h
    ks = jax.random.split(key, 7)

    def u(k, shape, bound):
        return jax.random.uniform(k, shape, jnp.float32, -bound, bound)

    std = 1.0 / math.sqrt(dim_h1)           # MCW_RNN.reset()
    w_x = u(ks[0], (dim_y, dim_x, dim_h1), std)
    w_h = u(ks[1], (dim_y, dim_h1, dim_h1), std)
    b = u(ks[2], (dim_y, dim_h1), std)
    lin1 = 1.0 / math.sqrt(dim_h1)          # nn.Linear(dim_h1, dim_h2)
    w1 = u(ks[3], (dim_y, dim_h1, dim_h2), lin1)   # stored (in, out)
    b1 = u(ks[4], (dim_y, dim_h2), lin1)
    lin2 = 1.0 / math.sqrt(dim_h2)          # nn.Linear(dim_h2, 1)
    w2 = u(ks[5], (dim_y, dim_h2), lin2)
    b2 = u(ks[6], (dim_y,), lin2)
    return (w_x, w_h, b, w1, b1, w2, b2)


def mcw_rnn_reference(x, params, *, n1, n2, n3, multiplier, x2_rate, x3_rate):
    """Pure-JAX reference mirroring the PyTorch forward (mode='slowest')."""
    w_x, w_h, b, w1, b1, w2, b2 = params
    dim_y = w_x.shape[0]
    B, T, _ = x.shape
    d1, d2, d3 = n1 * multiplier, n2 * multiplier, n3 * multiplier
    y_list = []
    for i in range(dim_y):
        h1 = jnp.zeros((B, d1), jnp.float32)
        h2 = jnp.zeros((B, d2), jnp.float32)
        h3 = jnp.zeros((B, d3), jnp.float32)
        for j in range(T):
            h = jnp.concatenate((h1, h2, h3), axis=1)
            if (j + 1) % x2_rate == 0:
                if (j + 1) % x3_rate == 0:
                    h1 = jnp.tanh(x[:, j] @ w_x[i][:, :d1] + h @ w_h[i][:, :d1] + b[i][:d1])
                    h2 = jnp.tanh(x[:, j] @ w_x[i][:, d1:d1 + d2] + h @ w_h[i][:, d1:d1 + d2] + b[i][d1:d1 + d2])
                    h3 = jnp.tanh(x[:, j] @ w_x[i][:, -d3:] + h @ w_h[i][:, -d3:] + b[i][-d3:])
                else:
                    h1 = jnp.tanh(x[:, j, :n1 + n2] @ w_x[i][:n1 + n2, :d1] + h @ w_h[i][:, :d1] + b[i][:d1])
                    h2 = jnp.tanh(x[:, j, :n1 + n2] @ w_x[i][:n1 + n2, d1:d1 + d2] + h @ w_h[i][:, d1:d1 + d2] + b[i][d1:d1 + d2])
            else:
                h1 = jnp.tanh(x[:, j, :n1] @ w_x[i][:n1, :d1] + h @ w_h[i][:, :d1] + b[i][:d1])
        h_final = jnp.concatenate((h1, h2, h3), axis=1)                 # (B, dim_h1)
        z = jnp.maximum(h_final @ w1[i] + b1[i], 0.0)                   # (B, dim_h2)
        y_list.append(z @ w2[i] + b2[i])                                # (B,)
    return jnp.stack(y_list, axis=1)                                    # (B, dim_y)


if __name__ == "__main__":
    # Small shapes consistent with the module: 3 feature groups, 2 clock rates.
    n1, n2, n3 = 8, 4, 4           # len(args.x1/x2/x3) -> dim_x = 16
    multiplier = 2                 # dim_h1 = 32
    dim_h = 32                     # dim_h2
    dim_y = 4
    x2_rate, x3_rate = 2, 4
    B = 8
    dim_x = n1 + n2 + n3

    key = jax.random.PRNGKey(0)
    k_x, k_x2, k_p = jax.random.split(key, 3)
    params = init_params(k_p, n1, n2, n3, multiplier, dim_h, dim_y)

    common = dict(n1=n1, n2=n2, n3=n3, multiplier=multiplier,
                  x2_rate=x2_rate, x3_rate=x3_rate)

    # 1) Default path: single time chunk (T fits in one chunk).
    T = 8
    x = jax.random.normal(k_x, (B, T, dim_x), dtype=jnp.float32)
    out = jax.block_until_ready(mcw_rnn_forward(x, params, **common))
    ref = mcw_rnn_reference(x, params, **common)
    assert out.shape == (B, dim_y)
    assert jnp.allclose(out, ref, atol=2e-4, rtol=2e-4), "mismatch (single chunk)"

    # 2) Chunked path: hidden state carried across time chunks in VMEM scratch.
    out_c = jax.block_until_ready(mcw_rnn_forward(x, params, time_chunk=4, **common))
    assert jnp.allclose(out_c, ref, atol=2e-4, rtol=2e-4), "mismatch (chunked)"

    # 3) Ragged T (padded last chunk with in-kernel validity guard).
    T2 = 10
    x2 = jax.random.normal(k_x2, (B, T2, dim_x), dtype=jnp.float32)
    out_r = jax.block_until_ready(mcw_rnn_forward(x2, params, time_chunk=4, **common))
    ref_r = mcw_rnn_reference(x2, params, **common)
    assert jnp.allclose(out_r, ref_r, atol=2e-4, rtol=2e-4), "mismatch (padded T)"

    print("KERNEL_OK")
</pallas_src>

<mosaic_0001>
module attributes {stable_mosaic.version = 11 : i64} {
  func.func @kernel(%arg0: i32, %arg1: i32, %arg2: memref<1x64x16xf32, #tpu.memory_space<vmem>>, %arg3: memref<4x1x128xf32, #tpu.memory_space<vmem>>, %arg4: memref<16x128xf32, #tpu.memory_space<vmem>>, %arg5: memref<128x128xf32, #tpu.memory_space<vmem>>, %arg6: memref<1x128xf32, #tpu.memory_space<vmem>>, %arg7: memref<128x128xf32, #tpu.memory_space<vmem>>, %arg8: memref<1x128xf32, #tpu.memory_space<vmem>>, %arg9: memref<128x4xf32, #tpu.memory_space<vmem>>, %arg10: memref<1x4xf32, #tpu.memory_space<vmem>>, %arg11: memref<8x4xf32, #tpu.memory_space<vmem>>, %arg12: memref<8x128xf32, #tpu.memory_space<vmem>>, %arg13: memref<64x128xf32, #tpu.memory_space<vmem>>) attributes {dimension_semantics = [#tpu.dimension_semantics<parallel>, #tpu.dimension_semantics<arbitrary>], iteration_bounds = array<i64: 1, 1>, scalar_prefetch = 0 : i64, scratch_operands = 2 : i64, tpu.core_type = #tpu.core_type<tc>, window_params = [{transform_indices = @transform_0, window_bounds = array<i64: 1, 64, 16>}, {pipeline_mode = #tpu.pipeline_mode<synchronous>, transform_indices = @transform_1, window_bounds = array<i64: 4, 1, 128>}, {pipeline_mode = #tpu.pipeline_mode<synchronous>, transform_indices = @transform_2, window_bounds = array<i64: 16, 128>}, {pipeline_mode = #tpu.pipeline_mode<synchronous>, transform_indices = @transform_3, window_bounds = array<i64: 128, 128>}, {pipeline_mode = #tpu.pipeline_mode<synchronous>, transform_indices = @transform_4, window_bounds = array<i64: 1, 128>}, {pipeline_mode = #tpu.pipeline_mode<synchronous>, transform_indices = @transform_5, window_bounds = array<i64: 128, 128>}, {pipeline_mode = #tpu.pipeline_mode<synchronous>, transform_indices = @transform_6, window_bounds = array<i64: 1, 128>}, {pipeline_mode = #tpu.pipeline_mode<synchronous>, transform_indices = @transform_7, window_bounds = array<i64: 128, 4>}, {pipeline_mode = #tpu.pipeline_mode<synchronous>, transform_indices = @transform_8, window_bounds = array<i64: 1, 4>}, {transform_indices = @transform_9, window_bounds = array<i64: 8, 4>}]} {
    %c0_i32 = arith.constant 0 : i32
    %0 = arith.cmpi eq, %arg1, %c0_i32 : i32
    %1 = arith.extui %0 : i1 to i32
    %c0_i32_0 = arith.constant 0 : i32
    %2 = arith.cmpi ne, %1, %c0_i32_0 : i32
    scf.if %2 {
      %cst_64 = arith.constant 0.000000e+00 : f32
      %129 = vector.broadcast %cst_64 : f32 to vector<8x128xf32>
      %c0_65 = arith.constant 0 : index
      %c0_66 = arith.constant 0 : index
      %130 = vector.load %arg12[%c0_65, %c0_66] : memref<8x128xf32, #tpu.memory_space<vmem>>, vector<8x128xf32>
      tpu.vector_store %arg12[%c0_65, %c0_66], %129 {strides = array<i32>} : memref<8x128xf32, #tpu.memory_space<vmem>>, vector<8x128xf32>,
    } else {
    }
    %c0 = arith.constant 0 : index
    %c0_1 = arith.constant 0 : index
    %c0_2 = arith.constant 0 : index
    %3 = vector.load %arg2[%c0, %c0_1, %c0_2] : memref<1x64x16xf32, #tpu.memory_space<vmem>>, vector<1x64x16xf32>
    %4 = vector.shape_cast %3 : vector<1x64x16xf32> to vector<64x16xf32>
    %c0_3 = arith.constant 0 : index
    %c0_4 = arith.constant 0 : index
    %5 = vector.load %arg4[%c0_3, %c0_4] : memref<16x128xf32, #tpu.memory_space<vmem>>, vector<16x128xf32>
    %cst = arith.constant dense<0.000000e+00> : vector<64x128xf32>
    %6 = tpu.matmul %4, %5, %cst {dimension_numbers = #tpu.dot_dimension_numbers<[1], [0], [0], [1], [0, 0, 1, 1], [], []>} : vector<64x16xf32>, vector<16x128xf32>, vector<64x128xf32> -> vector<64x128xf32>
    %c0_5 = arith.constant 0 : index
    %c0_6 = arith.constant 0 : index
    %7 = vector.load %arg6[%c0_5, %c0_6] : memref<1x128xf32, #tpu.memory_space<vmem>>, vector<1x128xf32>
    %8 = vector.broadcast %7 : vector<1x128xf32> to vector<64x128xf32>
    %9 = arith.addf %6, %8 : vector<64x128xf32>
    %c0_7 = arith.constant 0 : index
    %c0_8 = arith.constant 0 : index
    %10 = vector.load %arg13[%c0_7, %c0_8] : memref<64x128xf32, #tpu.memory_space<vmem>>, vector<64x128xf32>
    tpu.vector_store %arg13[%c0_7, %c0_8], %9 {strides = array<i32>} : memref<64x128xf32, #tpu.memory_space<vmem>>, vector<64x128xf32>,
    %c0_9 = arith.constant 0 : index
    %c0_10 = arith.constant 0 : index
    %11 = vector.load %arg5[%c0_9, %c0_10] : memref<128x128xf32, #tpu.memory_space<vmem>>, vector<128x128xf32>
    %c0_11 = arith.constant 0 : index
    %c0_12 = arith.constant 0 : index
    %c0_13 = arith.constant 0 : index
    %12 = vector.load %arg3[%c0_11, %c0_12, %c0_13] : memref<4x1x128xf32, #tpu.memory_space<vmem>>, vector<1x1x128xf32>
    %13 = vector.shape_cast %12 : vector<1x1x128xf32> to vector<1x128xf32>
    %c1 = arith.constant 1 : index
    %c0_14 = arith.constant 0 : index
    %c0_15 = arith.constant 0 : index
    %14 = vector.load %arg3[%c1, %c0_14, %c0_15] : memref<4x1x128xf32, #tpu.memory_space<vmem>>, vector<1x1x128xf32>
    %15 = vector.shape_cast %14 : vector<1x1x128xf32> to vector<1x128xf32>
    %c2 = arith.constant 2 : index
    %c0_16 = arith.constant 0 : index
    %c0_17 = arith.constant 0 : index
    %16 = vector.load %arg3[%c2, %c0_16, %c0_17] : memref<4x1x128xf32, #tpu.memory_space<vmem>>, vector<1x1x128xf32>
    %17 = vector.shape_cast %16 : vector<1x1x128xf32> to vector<1x128xf32>
    %c3 = arith.constant 3 : index
    %c0_18 = arith.constant 0 : index
    %c0_19 = arith.constant 0 : index
    %18 = vector.load %arg3[%c3, %c0_18, %c0_19] : memref<4x1x128xf32, #tpu.memory_space<vmem>>, vector<1x1x128xf32>
    %19 = vector.shape_cast %18 : vector<1x1x128xf32> to vector<1x128xf32>
    %c0_20 = arith.constant 0 : index
    %c0_21 = arith.constant 0 : index
    %20 = vector.load %arg12[%c0_20, %c0_21] : memref<8x128xf32, #tpu.memory_space<vmem>>, vector<8x128xf32>
    %c0_i32_22 = arith.constant 0 : i32
    %c4_i32 = arith.constant 4 : i32
    %21 = arith.muli %c0_i32_22, %c4_i32 : i32
    %c0_i32_23 = arith.constant 0 : i32
    %22 = arith.addi %21, %c0_i32_23 : i32
    %c8_i32 = arith.constant 8 : i32
    %23 = arith.muli %22, %c8_i32 : i32
    %24 = tpu.assume_multiple %23, 8 : i32
    %25 = arith.index_cast %24 : i32 to index
    %c0_24 = arith.constant 0 : index
    %26 = vector.load %arg13[%25, %c0_24] : memref<64x128xf32, #tpu.memory_space<vmem>>, vector<8x128xf32>
    %cst_25 = arith.constant dense<0.000000e+00> : vector<8x128xf32>
    %27 = tpu.matmul %20, %11, %cst_25 {dimension_numbers = #tpu.dot_dimension_numbers<[1], [0], [0], [1], [0, 0, 1, 1], [], []>} : vector<8x128xf32>, vector<128x128xf32>, vector<8x128xf32> -> vector<8x128xf32>
    %28 = arith.addf %26, %27 : vector<8x128xf32>
    %29 = math.tanh %28 : vector<8x128xf32>
    %30 = arith.subf %29, %20 : vector<8x128xf32>
    %31 = vector.broadcast %13 : vector<1x128xf32> to vector<8x128xf32>
    %32 = arith.mulf %31, %30 : vector<8x128xf32>
    %33 = arith.addf %20, %32 : vector<8x128xf32>
    %c4_i32_26 = arith.constant 4 : i32
    %34 = arith.muli %c0_i32_22, %c4_i32_26 : i32
    %c1_i32 = arith.constant 1 : i32
    %35 = arith.addi %34, %c1_i32 : i32
    %c8_i32_27 = arith.constant 8 : i32
    %36 = arith.muli %35, %c8_i32_27 : i32
    %37 = tpu.assume_multiple %36, 8 : i32
    %38 = arith.index_cast %37 : i32 to index
    %c0_28 = arith.constant 0 : index
    %39 = vector.load %arg13[%38, %c0_28] : memref<64x128xf32, #tpu.memory_space<vmem>>, vector<8x128xf32>
    %cst_29 = arith.constant dense<0.000000e+00> : vector<8x128xf32>
    %40 = tpu.matmul %33, %11, %cst_29 {dimension_numbers = #tpu.dot_dimension_numbers<[1], [0], [0], [1], [0, 0, 1, 1], [], []>} : vector<8x128xf32>, vector<128x128xf32>, vector<8x128xf32> -> vector<8x128xf32>
    %41 = arith.addf %39, %40 : vector<8x128xf32>
    %42 = math.tanh %41 : vector<8x128xf32>
    %43 = arith.subf %42, %33 : vector<8x128xf32>
    %44 = vector.broadcast %15 : vector<1x128xf32> to vector<8x128xf32>
    %45 = arith.mulf %44, %43 : vector<8x128xf32>
    %46 = arith.addf %33, %45 : vector<8x128xf32>
    %c4_i32_30 = arith.constant 4 : i32
    %47 = arith.muli %c0_i32_22, %c4_i32_30 : i32
    %c2_i32 = arith.constant 2 : i32
    %48 = arith.addi %47, %c2_i32 : i32
    %c8_i32_31 = arith.constant 8 : i32
    %49 = arith.muli %48, %c8_i32_31 : i32
    %50 = tpu.assume_multiple %49, 8 : i32
    %51 = arith.index_cast %50 : i32 to index
    %c0_32 = arith.constant 0 : index
    %52 = vector.load %arg13[%51, %c0_32] : memref<64x128xf32, #tpu.memory_space<vmem>>, vector<8x128xf32>
    %cst_33 = arith.constant dense<0.000000e+00> : vector<8x128xf32>
    %53 = tpu.matmul %46, %11, %cst_33 {dimension_numbers = #tpu.dot_dimension_numbers<[1], [0], [0], [1], [0, 0, 1, 1], [], []>} : vector<8x128xf32>, vector<128x128xf32>, vector<8x128xf32> -> vector<8x128xf32>
    %54 = arith.addf %52, %53 : vector<8x128xf32>
    %55 = math.tanh %54 : vector<8x128xf32>
    %56 = arith.subf %55, %46 : vector<8x128xf32>
    %57 = vector.broadcast %17 : vector<1x128xf32> to vector<8x128xf32>
    %58 = arith.mulf %57, %56 : vector<8x128xf32>
    %59 = arith.addf %46, %58 : vector<8x128xf32>
    %c4_i32_34 = arith.constant 4 : i32
    %60 = arith.muli %c0_i32_22, %c4_i32_34 : i32
    %c3_i32 = arith.constant 3 : i32
    %61 = arith.addi %60, %c3_i32 : i32
    %c8_i32_35 = arith.constant 8 : i32
    %62 = arith.muli %61, %c8_i32_35 : i32
    %63 = tpu.assume_multiple %62, 8 : i32
    %64 = arith.index_cast %63 : i32 to index
    %c0_36 = arith.constant 0 : index
    %65 = vector.load %arg13[%64, %c0_36] : memref<64x128xf32, #tpu.memory_space<vmem>>, vector<8x128xf32>
    %cst_37 = arith.constant dense<0.000000e+00> : vector<8x128xf32>
    %66 = tpu.matmul %59, %11, %cst_37 {dimension_numbers = #tpu.dot_dimension_numbers<[1], [0], [0], [1], [0, 0, 1, 1], [], []>} : vector<8x128xf32>, vector<128x128xf32>, vector<8x128xf32> -> vector<8x128xf32>
    %67 = arith.addf %65, %66 : vector<8x128xf32>
    %68 = math.tanh %67 : vector<8x128xf32>
    %69 = arith.subf %68, %59 : vector<8x128xf32>
    %70 = vector.broadcast %19 : vector<1x128xf32> to vector<8x128xf32>
    %71 = arith.mulf %70, %69 : vector<8x128xf32>
    %72 = arith.addf %59, %71 : vector<8x128xf32>
    %c1_i32_38 = arith.constant 1 : i32
    %c4_i32_39 = arith.constant 4 : i32
    %73 = arith.muli %c1_i32_38, %c4_i32_39 : i32
    %c0_i32_40 = arith.constant 0 : i32
    %74 = arith.addi %73, %c0_i32_40 : i32
    %c8_i32_41 = arith.constant 8 : i32
    %75 = arith.muli %74, %c8_i32_41 : i32
    %76 = tpu.assume_multiple %75, 8 : i32
    %77 = arith.index_cast %76 : i32 to index
    %c0_42 = arith.constant 0 : index
    %78 = vector.load %arg13[%77, %c0_42] : memref<64x128xf32, #tpu.memory_space<vmem>>, vector<8x128xf32>
    %cst_43 = arith.constant dense<0.000000e+00> : vector<8x128xf32>
    %79 = tpu.matmul %72, %11, %cst_43 {dimension_numbers = #tpu.dot_dimension_numbers<[1], [0], [0], [1], [0, 0, 1, 1], [], []>} : vector<8x128xf32>, vector<128x128xf32>, vector<8x128xf32> -> vector<8x128xf32>
    %80 = arith.addf %78, %79 : vector<8x128xf32>
    %81 = math.tanh %80 : vector<8x128xf32>
    %82 = arith.subf %81, %72 : vector<8x128xf32>
    %83 = vector.broadcast %13 : vector<1x128xf32> to vector<8x128xf32>
    %84 = arith.mulf %83, %82 : vector<8x128xf32>
    %85 = arith.addf %72, %84 : vector<8x128xf32>
    %c4_i32_44 = arith.constant 4 : i32
    %86 = arith.muli %c1_i32_38, %c4_i32_44 : i32
    %c1_i32_45 = arith.constant 1 : i32
    %87 = arith.addi %86, %c1_i32_45 : i32
    %c8_i32_46 = arith.constant 8 : i32
    %88 = arith.muli %87, %c8_i32_46 : i32
    %89 = tpu.assume_multiple %88, 8 : i32
    %90 = arith.index_cast %89 : i32 to index
    %c0_47 = arith.constant 0 : index
    %91 = vector.load %arg13[%90, %c0_47] : memref<64x128xf32, #tpu.memory_space<vmem>>, vector<8x128xf32>
    %cst_48 = arith.constant dense<0.000000e+00> : vector<8x128xf32>
    %92 = tpu.matmul %85, %11, %cst_48 {dimension_numbers = #tpu.dot_dimension_numbers<[1], [0], [0], [1], [0, 0, 1, 1], [], []>} : vector<8x128xf32>, vector<128x128xf32>, vector<8x128xf32> -> vector<8x128xf32>
    %93 = arith.addf %91, %92 : vector<8x128xf32>
    %94 = math.tanh %93 : vector<8x128xf32>
    %95 = arith.subf %94, %85 : vector<8x128xf32>
    %96 = vector.broadcast %15 : vector<1x128xf32> to vector<8x128xf32>
    %97 = arith.mulf %96, %95 : vector<8x128xf32>
    %98 = arith.addf %85, %97 : vector<8x128xf32>
    %c4_i32_49 = arith.constant 4 : i32
    %99 = arith.muli %c1_i32_38, %c4_i32_49 : i32
    %c2_i32_50 = arith.constant 2 : i32
    %100 = arith.addi %99, %c2_i32_50 : i32
    %c8_i32_51 = arith.constant 8 : i32
    %101 = arith.muli %100, %c8_i32_51 : i32
    %102 = tpu.assume_multiple %101, 8 : i32
    %103 = arith.index_cast %102 : i32 to index
    %c0_52 = arith.constant 0 : index
    %104 = vector.load %arg13[%103, %c0_52] : memref<64x128xf32, #tpu.memory_space<vmem>>, vector<8x128xf32>
    %cst_53 = arith.constant dense<0.000000e+00> : vector<8x128xf32>
    %105 = tpu.matmul %98, %11, %cst_53 {dimension_numbers = #tpu.dot_dimension_numbers<[1], [0], [0], [1], [0, 0, 1, 1], [], []>} : vector<8x128xf32>, vector<128x128xf32>, vector<8x128xf32> -> vector<8x128xf32>
    %106 = arith.addf %104, %105 : vector<8x128xf32>
    %107 = math.tanh %106 : vector<8x128xf32>
    %108 = arith.subf %107, %98 : vector<8x128xf32>
    %109 = vector.broadcast %17 : vector<1x128xf32> to vector<8x128xf32>
    %110 = arith.mulf %109, %108 : vector<8x128xf32>
    %111 = arith.addf %98, %110 : vector<8x128xf32>
    %c4_i32_54 = arith.constant 4 : i32
    %112 = arith.muli %c1_i32_38, %c4_i32_54 : i32
    %c3_i32_55 = arith.constant 3 : i32
    %113 = arith.addi %112, %c3_i32_55 : i32
    %c8_i32_56 = arith.constant 8 : i32
    %114 = arith.muli %113, %c8_i32_56 : i32
    %115 = tpu.assume_multiple %114, 8 : i32
    %116 = arith.index_cast %115 : i32 to index
    %c0_57 = arith.constant 0 : index
    %117 = vector.load %arg13[%116, %c0_57] : memref<64x128xf32, #tpu.memory_space<vmem>>, vector<8x128xf32>
    %cst_58 = arith.constant dense<0.000000e+00> : vector<8x128xf32>
    %118 = tpu.matmul %111, %11, %cst_58 {dimension_numbers = #tpu.dot_dimension_numbers<[1], [0], [0], [1], [0, 0, 1, 1], [], []>} : vector<8x128xf32>, vector<128x128xf32>, vector<8x128xf32> -> vector<8x128xf32>
    %119 = arith.addf %117, %118 : vector<8x128xf32>
    %120 = math.tanh %119 : vector<8x128xf32>
    %121 = arith.subf %120, %111 : vector<8x128xf32>
    %122 = vector.broadcast %19 : vector<1x128xf32> to vector<8x128xf32>
    %123 = arith.mulf %122, %121 : vector<8x128xf32>
    %124 = arith.addf %111, %123 : vector<8x128xf32>
    %c2_i32_59 = arith.constant 2 : i32
    %c0_60 = arith.constant 0 : index
    %c0_61 = arith.constant 0 : index
    %125 = vector.load %arg12[%c0_60, %c0_61] : memref<8x128xf32, #tpu.memory_space<vmem>>, vector<8x128xf32>
    tpu.vector_store %arg12[%c0_60, %c0_61], %124 {strides = array<i32>} : memref<8x128xf32, #tpu.memory_space<vmem>>, vector<8x128xf32>,
    %c0_i32_62 = arith.constant 0 : i32
    %126 = arith.cmpi eq, %arg1, %c0_i32_62 : i32
    %127 = arith.extui %126 : i1 to i32
    %c0_i32_63 = arith.constant 0 : i32
    %128 = arith.cmpi ne, %127, %c0_i32_63 : i32
    scf.if %128 {
      %c0_64 = arith.constant 0 : index
      %c0_65 = arith.constant 0 : index
      %129 = vector.load %arg7[%c0_64, %c0_65] : memref<128x128xf32, #tpu.memory_space<vmem>>, vector<128x128xf32>
      %cst_66 = arith.constant dense<0.000000e+00> : vector<8x128xf32>
      %130 = tpu.matmul %124, %129, %cst_66 {dimension_numbers = #tpu.dot_dimension_numbers<[1], [0], [0], [1], [0, 0, 1, 1], [], []>} : vector<8x128xf32>, vector<128x128xf32>, vector<8x128xf32> -> vector<8x128xf32>
      %c0_67 = arith.constant 0 : index
      %c0_68 = arith.constant 0 : index
      %131 = vector.load %arg8[%c0_67, %c0_68] : memref<1x128xf32, #tpu.memory_space<vmem>>, vector<1x128xf32>
      %132 = vector.broadcast %131 : vector<1x128xf32> to vector<8x128xf32>
      %133 = arith.addf %130, %132 : vector<8x128xf32>
      %cst_69 = arith.constant 0.000000e+00 : f32
      %134 = vector.broadcast %cst_69 : f32 to vector<8x128xf32>
      %135 = arith.maximumf %133, %134 : vector<8x128xf32>
      %c0_70 = arith.constant 0 : index
      %c0_71 = arith.constant 0 : index
      %136 = vector.load %arg9[%c0_70, %c0_71] : memref<128x4xf32, #tpu.memory_space<vmem>>, vector<128x4xf32>
      %cst_72 = arith.constant dense<0.000000e+00> : vector<8x4xf32>
      %137 = tpu.matmul %135, %136, %cst_72 {dimension_numbers = #tpu.dot_dimension_numbers<[1], [0], [0], [1], [0, 0, 1, 1], [], []>} : vector<8x128xf32>, vector<128x4xf32>, vector<8x4xf32> -> vector<8x4xf32>
      %c0_73 = arith.constant 0 : index
      %c0_74 = arith.constant 0 : index
      %138 = vector.load %arg10[%c0_73, %c0_74] : memref<1x4xf32, #tpu.memory_space<vmem>>, vector<1x4xf32>
      %139 = vector.broadcast %138 : vector<1x4xf32> to vector<8x4xf32>
      %140 = arith.addf %137, %139 : vector<8x4xf32>
      %c0_75 = arith.constant 0 : index
      %c0_76 = arith.constant 0 : index
      %141 = vector.load %arg11[%c0_75, %c0_76] : memref<8x4xf32, #tpu.memory_space<vmem>>, vector<8x4xf32>
      tpu.vector_store %arg11[%c0_75, %c0_76], %140 {strides = array<i32>} : memref<8x4xf32, #tpu.memory_space<vmem>>, vector<8x4xf32>,
    } else {
    }
    return
  }
  func.func @transform_0(%arg0: i32, %arg1: i32) -> (i32, i32, i32) {
    %c0_i32 = arith.constant 0 : i32
    %c0_i32_0 = arith.constant 0 : i32
    return %arg0, %arg1, %c0_i32 : i32, i32, i32
  }
  func.func @transform_1(%arg0: i32, %arg1: i32) -> (i32, i32, i32) {
    %c0_i32 = arith.constant 0 : i32
    %c0_i32_0 = arith.constant 0 : i32
    %c0_i32_1 = arith.constant 0 : i32
    %c0_i32_2 = arith.constant 0 : i32
    return %c0_i32, %c0_i32_0, %c0_i32_1 : i32, i32, i32
  }
  func.func @transform_2(%arg0: i32, %arg1: i32) -> (i32, i32) {
    %c0_i32 = arith.constant 0 : i32
    %c0_i32_0 = arith.constant 0 : i32
    %c0_i32_1 = arith.constant 0 : i32
    return %c0_i32, %c0_i32_0 : i32, i32
  }
  func.func @transform_3(%arg0: i32, %arg1: i32) -> (i32, i32) {
    %c0_i32 = arith.constant 0 : i32
    %c0_i32_0 = arith.constant 0 : i32
    %c0_i32_1 = arith.constant 0 : i32
    return %c0_i32, %c0_i32_0 : i32, i32
  }
  func.func @transform_4(%arg0: i32, %arg1: i32) -> (i32, i32) {
    %c0_i32 = arith.constant 0 : i32
    %c0_i32_0 = arith.constant 0 : i32
    %c0_i32_1 = arith.constant 0 : i32
    return %c0_i32, %c0_i32_0 : i32, i32
  }
  func.func @transform_5(%arg0: i32, %arg1: i32) -> (i32, i32) {
    %c0_i32 = arith.constant 0 : i32
    %c0_i32_0 = arith.constant 0 : i32
    %c0_i32_1 = arith.constant 0 : i32
    return %c0_i32, %c0_i32_0 : i32, i32
  }
  func.func @transform_6(%arg0: i32, %arg1: i32) -> (i32, i32) {
    %c0_i32 = arith.constant 0 : i32
    %c0_i32_0 = arith.constant 0 : i32
    %c0_i32_1 = arith.constant 0 : i32
    return %c0_i32, %c0_i32_0 : i32, i32
  }
  func.func @transform_7(%arg0: i32, %arg1: i32) -> (i32, i32) {
    %c0_i32 = arith.constant 0 : i32
    %c0_i32_0 = arith.constant 0 : i32
    %c0_i32_1 = arith.constant 0 : i32
    return %c0_i32, %c0_i32_0 : i32, i32
  }
  func.func @transform_8(%arg0: i32, %arg1: i32) -> (i32, i32) {
    %c0_i32 = arith.constant 0 : i32
    %c0_i32_0 = arith.constant 0 : i32
    %c0_i32_1 = arith.constant 0 : i32
    return %c0_i32, %c0_i32_0 : i32, i32
  }
  func.func @transform_9(%arg0: i32, %arg1: i32) -> (i32, i32) {
    %c0_i32 = arith.constant 0 : i32
    %c0_i32_0 = arith.constant 0 : i32
    return %arg0, %c0_i32 : i32, i32
  }
}

</mosaic_0001>

<bundles_post_ra>
// kernel: tpu_custom_call.1
= control target key start
LH: loop header
LB: loop body
LE: loop exit
PB: predicated region body
PF: predicated region fallthrough
CT: control target
= control target key end

     0   :  { %14 = vsyncpa [#allocation5], 0  ;;  %s1674_s30 = smov [#allocation4]   ;;  %s2277_s0 = inlined_call_operand.vmem [shape: f32[1,64,16], index: 0, kind: input, shape index: {}]   ;;  %s2278_s1 = inlined_call_operand.vmem [shape: f32[4,1,128], index: 1, kind: input, shape index: {}]   ;;  %s2279_s2 = inlined_call_operand.vmem [shape: f32[16,128], index: 2, kind: input, shape index: {}]   ;;  %s2280_s3 = inlined_call_operand.vmem [shape: f32[128,128], index: 3, kind: input, shape index: {}]   ;;  %s2281_s4 = inlined_call_operand.vmem [shape: f32[1,128], index: 4, kind: input, shape index: {}]   ;;  %s2282_s5 = inlined_call_operand.hbm [shape: f32[128,128], index: 5, kind: input, shape index: {}]   ;;  %s2283_s6 = inlined_call_operand.vmem [shape: f32[1,128], index: 6, kind: input, shape index: {}]   ;;  %s2284_s7 = inlined_call_operand.vmem [shape: f32[128,4], index: 7, kind: input, shape index: {}]   ;;  %s2285_s8 = inlined_call_operand.vmem [shape: f32[1,4], index: 8, kind: input, shape index: {}]   ;;  %s2286_s9 = inlined_call_operand.vmem [shape: f32[8,4], index: 9, kind: output, shape index: {}]  }
   0x1   :  { %s30_s10 = sshll.u32 %s1674_s30, 4  ;;  %s31_s10 = int_to_ptr.vmem [resolvable:$true] %s30_s10 }
   0x2   :  { %s1660_s11 = scalar_lea.vmem %s31_s10, 2048  ;;  %p1665_p1 = scmp.lt.s32.totalorder %s31_s10, %s31_s10 }
   0x3   :  { %p1661_p0 = scmp.ne.s32.totalorder %s31_s10, %s1660_s11  ;;  %p1666_p2 = scmp.lt.s32.totalorder %s1660_s11, %s1660_s11 }
   0x5   :  { %p1667_p3 = por %p1666_p2, %p1665_p1 }
   0x7   :  { %p1668_p4 = pnand %p1667_p3, %p1661_p0 }
   0x9   :  { %1671 = shalt.err (!%p1668_p4)
}
   0xa   :  { %s1675_s12 = smov 128   ;;  %s1676_s13 = smov 8  }
   0xb   :  { %36 = dma.hbm_to_vmem [thread:$0]  %s2282_s5, 2048, %s31_s10, [#allocation5], %s1675_s12, %s1675_s12, %s1676_s13  }
   0xc   :  { %1672 = dma.done.wait [#allocation5], 2048  }
   0xd   :  { %1673 = vsyncadd [#allocation5], 4294965248  ;;  %v1677_v0 = vmov 0.0   ;;  %vm1678_vm0 = vmmov 0   ;;  %v1738_v1 = vld [vmem:[%s2280_s3 + $0x78] sm:$0xff]  ;;  %v1743_v2 = vld [vmem:[%s2280_s3 + $0x70] sm:$0xff] }
   0xe   :  { %1281 = vmatprep.subr.mxu1 %v1677_v0  ;;  %1313 = vmatprep.mubr.msk.f32.mxu1 %vm1678_vm0, %v1677_v0  ;;  %v1750_v3 = vld [vmem:[%s2280_s3 + $0x68] sm:$0xff]  ;;  %v1760_v5 = vld [vmem:[%s2280_s3 + $0x60] sm:$0xff]  ;;  %vm68_vm1 = vcmask 130048   ;;  %v1773_v8 = vld [vmem:[%s2280_s3 + $0x58] sm:$0xff]  ;;  %vm1060_vm2 = vcmask 31744  }
   0xf   :  { %1282 = vmatpush3.msra.mxu1 %v1738_v1  ;;  %v60_v4 = vld [vmem:[%s2279_s2 + $0x8] sm:$0xff]  ;;  %v59_v6 = vld [vmem:[%s2279_s2] sm:$0xff]  ;;  %v1783_v10 = vld [vmem:[%s2280_s3 + $0x50] sm:$0xff] }
  0x10   :  { %1283 = vmatprep.subr.mxu1 %v1677_v0  ;;  %1265 = vmatprep.subr.mxu0 %v60_v4  ;;  %v51_v7 = vld [vmem:[%s2277_s0] sm:$0xff]  ;;  %v52_v9 = vld [vmem:[%s2277_s0 + $0x8] sm:$0xff]  ;;  %v1810_v13 = vld [vmem:[%s2280_s3 + $0x38] sm:$0xff] }
  0x11   :  { %1284 = vmatpush3.msra.mxu1 %v1743_v2  ;;  %1266 = vmatpush3.msra.mxu0 %v60_v4  ;;  %v1792_v11 = vld [vmem:[%s2280_s3 + $0x48] sm:$0xff]  ;;  %v1801_v12 = vld [vmem:[%s2280_s3 + $0x40] sm:$0xff]  ;;  %v1819_v14 = vld [vmem:[%s2280_s3 + $0x30] sm:$0xff] }
  0x12   :  { %1285 = vmatprep.subr.mxu1 %v1677_v0  ;;  %1267 = vmatprep.subr.mxu0 %v59_v6  ;;  %v1828_v15 = vld [vmem:[%s2280_s3 + $0x28] sm:$0xff]  ;;  %v1837_v16 = vld [vmem:[%s2280_s3 + $0x20] sm:$0xff]  ;;  %v1846_v17 = vld [vmem:[%s2280_s3 + $0x18] sm:$0xff] }
  0x13   :  { %1286 = vmatpush3.msra.mxu1 %v1750_v3  ;;  %1268 = vmatpush3.msra.mxu0 %v59_v6  ;;  %v1855_v18 = vld [vmem:[%s2280_s3 + $0x10] sm:$0xff]  ;;  %v1864_v19 = vld [vmem:[%s2280_s3 + $0x8] sm:$0xff]  ;;  %v1873_v20 = vld [vmem:[%s2280_s3] sm:$0xff] }
  0x14   :  { %1287 = vmatprep.subr.mxu1 %v1677_v0  ;;  %1269 = vmatprep.mubr.msk.f32.mxu0 %vm68_vm1, %v51_v7  ;;  %v53_v21 = vld [vmem:[%s2277_s0 + $0x10] sm:$0xff]  ;;  %v54_v22 = vld [vmem:[%s2277_s0 + $0x18] sm:$0xff]  ;;  %v55_v23 = vld [vmem:[%s2277_s0 + $0x20] sm:$0xff] }
  0x15   :  { %1288 = vmatpush3.msra.mxu1 %v1760_v5  ;;  %1270 = vmatmul.mubr.msk.f32.vlgmr.msra.gmra.mxu0 %vm68_vm1, %v52_v9  ;;  %v56_v24 = vld [vmem:[%s2277_s0 + $0x28] sm:$0xff]  ;;  %v57_v25 = vld [vmem:[%s2277_s0 + $0x30] sm:$0xff]  ;;  %v58_v26 = vld [vmem:[%s2277_s0 + $0x38] sm:$0xff] }
  0x16   :  { %1289 = vmatprep.subr.mxu1 %v1677_v0  ;;  %1316 = vmatprep.subr.mxu0 %v1677_v0  ;;  %v1958_v28 = vld [vmem:[%s2281_s4] ss:$0 sm:$0xff]  ;;  %v2015_v48 = vld [vmem:[%s2278_s1 + $0x1] ss:$0 sm:$0xff]  ;;  %v2056_v57 = vld [vmem:[%s2278_s1 + $0x2] ss:$0 sm:$0xff] }
  0x17   :  { %1290 = vmatpush3.msra.mxu1 %v1773_v8  ;;  %1317 = vmatpush3.msra.mxu0 %v1738_v1  ;;  %v1964_v34 = vld [vmem:[%s2278_s1] ss:$0 sm:$0xff]  ;;  %v2098_v7 = vld [vmem:[%s2278_s1 + $0x3] ss:$0 sm:$0xff] }
  0x18   :  { %1291 = vmatprep.subr.mxu1 %v1677_v0  ;;  %1318 = vmatprep.subr.mxu0 %v1677_v0 }
  0x19   :  { %1292 = vmatpush3.msra.mxu1 %v1783_v10  ;;  %1319 = vmatpush3.msra.mxu0 %v1743_v2 }
  0x1a   :  { %1293 = vmatprep.subr.mxu1 %v1677_v0  ;;  %1320 = vmatprep.subr.mxu0 %v1677_v0 }
  0x1b   :  { %1294 = vmatpush3.msra.mxu1 %v1792_v11  ;;  %1321 = vmatpush3.msra.mxu0 %v1750_v3 }
  0x1c   :  { %1295 = vmatprep.subr.mxu1 %v1677_v0  ;;  %1322 = vmatprep.subr.mxu0 %v1677_v0 }
  0x1d   :  { %1296 = vmatpush3.msra.mxu1 %v1801_v12  ;;  %1323 = vmatpush3.msra.mxu0 %v1760_v5 }
  0x1e   :  { %1297 = vmatprep.subr.mxu1 %v1677_v0  ;;  %1324 = vmatprep.subr.mxu0 %v1677_v0 }
  0x1f   :  { %1298 = vmatpush3.msra.mxu1 %v1810_v13  ;;  %1325 = vmatpush3.msra.mxu0 %v1773_v8 }
  0x20   :  { %1299 = vmatprep.subr.mxu1 %v1677_v0  ;;  %1326 = vmatprep.subr.mxu0 %v1677_v0 }
  0x21   :  { %1300 = vmatpush3.msra.mxu1 %v1819_v14  ;;  %1327 = vmatpush3.msra.mxu0 %v1783_v10 }
  0x22   :  { %1301 = vmatprep.subr.mxu1 %v1677_v0  ;;  %1328 = vmatprep.subr.mxu0 %v1677_v0 }
  0x23   :  { %1302 = vmatpush3.msra.mxu1 %v1828_v15  ;;  %1329 = vmatpush3.msra.mxu0 %v1792_v11 }
  0x24   :  { %1303 = vmatprep.subr.mxu1 %v1677_v0  ;;  %1330 = vmatprep.subr.mxu0 %v1677_v0 }
  0x25   :  { %1304 = vmatpush3.msra.mxu1 %v1837_v16  ;;  %1331 = vmatpush3.msra.mxu0 %v1801_v12 }
  0x26   :  { %1305 = vmatprep.subr.mxu1 %v1677_v0  ;;  %1332 = vmatprep.subr.mxu0 %v1677_v0 }
  0x27   :  { %1306 = vmatpush3.msra.mxu1 %v1846_v17  ;;  %1333 = vmatpush3.msra.mxu0 %v1810_v13 }
  0x28   :  { %1307 = vmatprep.subr.mxu1 %v1677_v0  ;;  %1334 = vmatprep.subr.mxu0 %v1677_v0 }
  0x29   :  { %1308 = vmatpush3.msra.mxu1 %v1855_v18  ;;  %1335 = vmatpush3.msra.mxu0 %v1819_v14 }
  0x2a   :  { %1309 = vmatprep.subr.mxu1 %v1677_v0  ;;  %1336 = vmatprep.subr.mxu0 %v1677_v0 }
  0x2b   :  { %1310 = vmatpush3.msra.mxu1 %v1864_v19  ;;  %1337 = vmatpush3.msra.mxu0 %v1828_v15 }
  0x2c   :  { %1311 = vmatprep.subr.mxu1 %v1677_v0  ;;  %1338 = vmatprep.subr.mxu0 %v1677_v0 }
  0x2d   :  { %1312 = vmatpush3.msra.mxu1 %v1873_v20  ;;  %1339 = vmatpush3.msra.mxu0 %v1837_v16 }
  0x2e   :  { %1314 = vmatmul.mubr.f32.vlgmr.msra.gmra.mxu1 %v1677_v0  ;;  %1351 = vmatprep.subr.mxu1 %v1677_v0 }
  0x2f   :  { %1340 = vmatprep.subr.mxu0 %v1677_v0  ;;  %1352 = vmatpush3.msra.mxu1 %v1738_v1 }
  0x30   :  { %1341 = vmatpush3.msra.mxu0 %v1846_v17  ;;  %1353 = vmatprep.subr.mxu1 %v1677_v0 }
  0x31   :  { %1342 = vmatprep.subr.mxu0 %v1677_v0  ;;  %1354 = vmatpush3.msra.mxu1 %v1743_v2 }
  0x32   :  { %1343 = vmatpush3.msra.mxu0 %v1855_v18  ;;  %1355 = vmatprep.subr.mxu1 %v1677_v0 }
  0x33   :  { %1344 = vmatprep.subr.mxu0 %v1677_v0  ;;  %1356 = vmatpush3.msra.mxu1 %v1750_v3 }
  0x34   :  { %1345 = vmatpush3.msra.mxu0 %v1864_v19  ;;  %1357 = vmatprep.subr.mxu1 %v1677_v0 }
  0x35   :  { %1346 = vmatprep.subr.mxu0 %v1677_v0  ;;  %1358 = vmatpush3.msra.mxu1 %v1760_v5 }
  0x36   :  { %1347 = vmatpush3.msra.mxu0 %v1873_v20  ;;  %1359 = vmatprep.subr.mxu1 %v1677_v0 }
  0x37   :  { %1360 = vmatpush3.msra.mxu1 %v1773_v8  ;;  %1383 = vmatprep.mubr.msk.f32.mxu1 %vm1678_vm0, %v1677_v0 }
  0x38   :  { %1361 = vmatprep.subr.mxu1 %v1677_v0  ;;  %1386 = vmatprep.subr.mxu0 %v1677_v0 }
  0x39   :  { %1362 = vmatpush3.msra.mxu1 %v1783_v10  ;;  %1272 = vmatprep.mubr.msk.f32.mxu0 %vm68_vm1, %v53_v21 }
  0x3a   :  { %1363 = vmatprep.subr.mxu1 %v1677_v0  ;;  %1273 = vmatmul.mubr.msk.f32.gmra.mxu0 %vm68_vm1, %v54_v22 }
  0x3b   :  { %1364 = vmatpush3.msra.mxu1 %v1792_v11  ;;  %1275 = vmatprep.mubr.msk.f32.mxu0 %vm68_vm1, %v55_v23 }
  0x3c   :  { %1365 = vmatprep.subr.mxu1 %v1677_v0 }
  0x3d   :  { %1366 = vmatpush3.msra.mxu1 %v1801_v12 }
  0x3e   :  { %1367 = vmatprep.subr.mxu1 %v1677_v0  ;;  %1276 = vmatmul.mubr.msk.f32.gmra.mxu0 %vm68_vm1, %v56_v24 }
  0x3f   :  { %1368 = vmatpush3.msra.mxu1 %v1810_v13  ;;  %1278 = vmatprep.mubr.msk.f32.mxu0 %vm68_vm1, %v57_v25 }
  0x40   :  { %1369 = vmatprep.subr.mxu1 %v1677_v0 }
  0x41   :  { %1370 = vmatpush3.msra.mxu1 %v1819_v14 }
  0x42   :  { %1371 = vmatprep.subr.mxu1 %v1677_v0  ;;  %1279 = vmatmul.mubr.msk.f32.gmra.mxu0 %vm68_vm1, %v58_v26 }
  0x43   :  { %1372 = vmatpush3.msra.mxu1 %v1828_v15  ;;  %1348 = vmatprep.mubr.msk.f32.mxu0 %vm1678_vm0, %v1677_v0 }
  0x44   :  { %1373 = vmatprep.subr.mxu1 %v1677_v0 }
  0x45   :  { %1374 = vmatpush3.msra.mxu1 %v1837_v16 }
  0x46   :  { %1375 = vmatprep.subr.mxu1 %v1677_v0 }
  0x47   :  { %1376 = vmatpush3.msra.mxu1 %v1846_v17 }
  0x48   :  { %1377 = vmatprep.subr.mxu1 %v1677_v0 }
  0x49   :  { %1378 = vmatpush3.msra.mxu1 %v1855_v18 }
  0x4a   :  { %1379 = vmatprep.subr.mxu1 %v1677_v0 }
  0x4b   :  { %1380 = vmatpush3.msra.mxu1 %v1864_v19 }
  0x4c   :  { %1381 = vmatprep.subr.mxu1 %v1677_v0 }
  0x4d   :  { %1382 = vmatpush3.msra.mxu1 %v1873_v20 }
  0x4e   :  { %1421 = vmatprep.subr.mxu1 %v1677_v0 }
  0xd5   :  { %v1271_v27 = vpop.f32.mrf.mxu0 }
  0xd6   :  { %v165_v43 = vadd.f32 %v1271_v27, %v1958_v28 }
  0xd7   :  { %v159_v29 = vpop.f32.mrf.mxu0 }
  0xd8   :  { %v160_v30 = vadd.f32 %v1958_v28, %v159_v29 }
  0xee   :  { %v297_v31 = vpop.f32.mrf.mxu1 }
  0xef   :  { %v301_v32 = vadd.f32 %v297_v31, %v160_v30 }
  0xf0   :  { %v1315_v33 = vpop.f32.mrf.mxu1 }
  0xf1   :  { %1636 = vtanh.f32 %v301_v32 }
  0xfa   :  { %v2001_v37 = vpop.f32.mrf.mxu0 }
  0xfb   :  { %v175_v61 = vadd.f32 %v2001_v37, %v1958_v28  ;;  %v883_v37 = vld [vmem:[#allocation4 + $0x50] sm:$0xff] }
  0xfc   :  { %v169_v38 = vpop.f32.mrf.mxu0 }
  0xfd   :  { %v170_v52 = vadd.f32 %v1958_v28, %v169_v38  ;;  %v882_v38 = vld [vmem:[#allocation4 + $0x48] sm:$0xff] }
  0xfe   :  { %v1637_v35 = vpop.eup %1636  ;;  %v2003_v39 = vpop.f32.mrf.mxu0 }
  0xff   :  { %v310_v36 = vmul.f32 %v1637_v35, %v1964_v34 }
 0x100   :  { %v2005_v40 = vpop.f32.mrf.mxu0 }
 0x101   :  { %1349 = vmatmul.mubr.f32.vlgmr.msra.gmra.mxu0 %v310_v36  ;;  %v180_v23 = vadd.f32 %v1958_v28, %v2005_v40  ;;  %v880_v40 = vld [vmem:[#allocation4 + $0x38] sm:$0xff] }
 0x102   :  { %1387 = vmatpush3.msra.mxu0 %v1738_v1  ;;  %1418 = vmatprep.mubr.msk.f32.mxu0 %vm1678_vm0, %v1677_v0  ;;  %v2007_v41 = vpop.f32.mrf.mxu0 }
 0x103   :  { %1388 = vmatprep.subr.mxu0 %v1677_v0 }
 0x104   :  { %1389 = vmatpush3.msra.mxu0 %v1743_v2  ;;  %v2009_v42 = vpop.f32.mrf.mxu0 }
 0x105   :  { %1390 = vmatprep.subr.mxu0 %v1677_v0 }
 0x106   :  { %1391 = vmatpush3.msra.mxu0 %v1750_v3 }
 0x107   :  { %1392 = vmatprep.subr.mxu0 %v1677_v0 }
 0x108   :  { %1393 = vmatpush3.msra.mxu0 %v1760_v5 }
 0x109   :  { %1394 = vmatprep.subr.mxu0 %v1677_v0 }
 0x10a   :  { %1395 = vmatpush3.msra.mxu0 %v1773_v8 }
 0x10b   :  { %1396 = vmatprep.subr.mxu0 %v1677_v0 }
 0x10c   :  { %1397 = vmatpush3.msra.mxu0 %v1783_v10 }
 0x10d   :  { %1398 = vmatprep.subr.mxu0 %v1677_v0 }
 0x10e   :  { %1399 = vmatpush3.msra.mxu0 %v1792_v11 }
 0x10f   :  { %1400 = vmatprep.subr.mxu0 %v1677_v0 }
 0x110   :  { %1401 = vmatpush3.msra.mxu0 %v1801_v12 }
 0x111   :  { %1402 = vmatprep.subr.mxu0 %v1677_v0 }
 0x112   :  { %1403 = vmatpush3.msra.mxu0 %v1810_v13 }
 0x113   :  { %1404 = vmatprep.subr.mxu0 %v1677_v0 }
 0x114   :  { %1405 = vmatpush3.msra.mxu0 %v1819_v14 }
 0x115   :  { %1406 = vmatprep.subr.mxu0 %v1677_v0 }
 0x116   :  { %1407 = vmatpush3.msra.mxu0 %v1828_v15 }
 0x117   :  { %1408 = vmatprep.subr.mxu0 %v1677_v0 }
 0x118   :  { %1409 = vmatpush3.msra.mxu0 %v1837_v16 }
 0x119   :  { %1410 = vmatprep.subr.mxu0 %v1677_v0 }
 0x11a   :  { %1411 = vmatpush3.msra.mxu0 %v1846_v17 }
 0x11b   :  { %1412 = vmatprep.subr.mxu0 %v1677_v0 }
 0x11c   :  { %1413 = vmatpush3.msra.mxu0 %v1855_v18 }
 0x11d   :  { %1414 = vmatprep.subr.mxu0 %v1677_v0 }
 0x11e   :  { %1415 = vmatpush3.msra.mxu0 %v1864_v19 }
 0x11f   :  { %1416 = vmatprep.subr.mxu0 %v1677_v0 }
 0x120   :  { %1417 = vmatpush3.msra.mxu0 %v1873_v20 }
 0x121   :  { %1456 = vmatprep.subr.mxu0 %v1677_v0 }
 0x1c1   :  { %v380_v44 = vpop.f32.mrf.mxu0 }
 0x1c2   :  { %v384_v45 = vadd.f32 %v380_v44, %v165_v43  ;;  %v878_v43 = vld [vmem:[#allocation4 + $0x28] sm:$0xff]  ;;  %v877_v44 = vld [vmem:[#allocation4 + $0x20] sm:$0xff] }
 0x1c3   :  { %v1350_v46 = vpop.f32.mrf.mxu0 }
 0x1c4   :  { %1638 = vtanh.f32 %v384_v45  ;;  %v876_v45 = vld [vmem:[#allocation4 + $0x18] sm:$0xff]  ;;  %v875_v46 = vld [vmem:[#allocation4 + $0x10] sm:$0xff] }
 0x1d1   :  { %v1639_v47 = vpop.eup %1638 }
 0x1d2   :  { %v386_v49 = vsub.f32 %v1639_v47, %v310_v36  ;;  %v874_v47 = vld [vmem:[#allocation4 + $0x8] sm:$0xff] }
 0x1d4   :  { %v393_v50 = vmul.f32 %v2015_v48, %v386_v49  ;;  %v982_v49 = vld [vmem:[%s2284_s7 + $0x78] sm:$0xff] }
 0x1d6   :  { %v394_v51 = vadd.f32 %v393_v50, %v310_v36  ;;  %v884_v36 = vld [vmem:[#allocation4 + $0x58] sm:$0xff]  ;;  %v981_v50 = vld [vmem:[%s2284_s7 + $0x70] sm:$0xff] }
 0x1d8   :  { %1384 = vmatmul.mubr.f32.vlgmr.msra.gmra.mxu1 %v394_v51 }
 0x1d9   :  { %1422 = vmatpush3.msra.mxu1 %v1738_v1  ;;  %1453 = vmatprep.mubr.msk.f32.mxu1 %vm1678_vm0, %v1677_v0 }
 0x1da   :  { %1423 = vmatprep.subr.mxu1 %v1677_v0 }
 0x1db   :  { %1424 = vmatpush3.msra.mxu1 %v1743_v2 }
 0x1dc   :  { %1425 = vmatprep.subr.mxu1 %v1677_v0 }
 0x1dd   :  { %1426 = vmatpush3.msra.mxu1 %v1750_v3 }
 0x1de   :  { %1427 = vmatprep.subr.mxu1 %v1677_v0 }
 0x1df   :  { %1428 = vmatpush3.msra.mxu1 %v1760_v5 }
 0x1e0   :  { %1429 = vmatprep.subr.mxu1 %v1677_v0 }
 0x1e1   :  { %1430 = vmatpush3.msra.mxu1 %v1773_v8 }
 0x1e2   :  { %1431 = vmatprep.subr.mxu1 %v1677_v0 }
 0x1e3   :  { %1432 = vmatpush3.msra.mxu1 %v1783_v10 }
 0x1e4   :  { %1433 = vmatprep.subr.mxu1 %v1677_v0 }
 0x1e5   :  { %1434 = vmatpush3.msra.mxu1 %v1792_v11 }
 0x1e6   :  { %1435 = vmatprep.subr.mxu1 %v1677_v0 }
 0x1e7   :  { %1436 = vmatpush3.msra.mxu1 %v1801_v12 }
 0x1e8   :  { %1437 = vmatprep.subr.mxu1 %v1677_v0 }
 0x1e9   :  { %1438 = vmatpush3.msra.mxu1 %v1810_v13 }
 0x1ea   :  { %1439 = vmatprep.subr.mxu1 %v1677_v0 }
 0x1eb   :  { %1440 = vmatpush3.msra.mxu1 %v1819_v14 }
 0x1ec   :  { %1441 = vmatprep.subr.mxu1 %v1677_v0 }
 0x1ed   :  { %1442 = vmatpush3.msra.mxu1 %v1828_v15 }
 0x1ee   :  { %1443 = vmatprep.subr.mxu1 %v1677_v0 }
 0x1ef   :  { %1444 = vmatpush3.msra.mxu1 %v1837_v16 }
 0x1f0   :  { %1445 = vmatprep.subr.mxu1 %v1677_v0 }
 0x1f1   :  { %1446 = vmatpush3.msra.mxu1 %v1846_v17 }
 0x1f2   :  { %1447 = vmatprep.subr.mxu1 %v1677_v0 }
 0x1f3   :  { %1448 = vmatpush3.msra.mxu1 %v1855_v18 }
 0x1f4   :  { %1449 = vmatprep.subr.mxu1 %v1677_v0 }
 0x1f5   :  { %1450 = vmatpush3.msra.mxu1 %v1864_v19 }
 0x1f6   :  { %1451 = vmatprep.subr.mxu1 %v1677_v0 }
 0x1f7   :  { %1452 = vmatpush3.msra.mxu1 %v1873_v20 }
 0x1f8   :  { %1491 = vmatprep.subr.mxu1 %v1677_v0 }
 0x298   :  { %v463_v53 = vpop.f32.mrf.mxu1 }
 0x299   :  { %v467_v54 = vadd.f32 %v463_v53, %v170_v52  ;;  %v979_v52 = vld [vmem:[%s2284_s7 + $0x60] sm:$0xff]  ;;  %v978_v53 = vld [vmem:[%s2284_s7 + $0x58] sm:$0xff] }
 0x29a   :  { %v1385_v55 = vpop.f32.mrf.mxu1 }
 0x29b   :  { %1640 = vtanh.f32 %v467_v54  ;;  %v977_v54 = vld [vmem:[%s2284_s7 + $0x50] sm:$0xff]  ;;  %v976_v55 = vld [vmem:[%s2284_s7 + $0x48] sm:$0xff] }
 0x2a8   :  { %v1641_v56 = vpop.eup %1640 }
 0x2a9   :  { %v469_v58 = vsub.f32 %v1641_v56, %v394_v51  ;;  %v975_v56 = vld [vmem:[%s2284_s7 + $0x40] sm:$0xff] }
 0x2ab   :  { %v476_v59 = vmul.f32 %v2056_v57, %v469_v58  ;;  %v973_v58 = vld [vmem:[%s2284_s7 + $0x30] sm:$0xff] }
 0x2ad   :  { %v477_v60 = vadd.f32 %v476_v59, %v394_v51  ;;  %v980_v51 = vld [vmem:[%s2284_s7 + $0x68] sm:$0xff] }
 0x2ae   :  { %v972_v59 = vld [vmem:[%s2284_s7 + $0x28] sm:$0xff] }
 0x2af   :  { %1419 = vmatmul.mubr.f32.vlgmr.msra.gmra.mxu0 %v477_v60 }
 0x2b0   :  { %1457 = vmatpush3.msra.mxu0 %v1738_v1  ;;  %1488 = vmatprep.mubr.msk.f32.mxu0 %vm1678_vm0, %v1677_v0 }
 0x2b1   :  { %1458 = vmatprep.subr.mxu0 %v1677_v0 }
 0x2b2   :  { %1459 = vmatpush3.msra.mxu0 %v1743_v2 }
 0x2b3   :  { %1460 = vmatprep.subr.mxu0 %v1677_v0 }
 0x2b4   :  { %1461 = vmatpush3.msra.mxu0 %v1750_v3 }
 0x2b5   :  { %1462 = vmatprep.subr.mxu0 %v1677_v0 }
 0x2b6   :  { %1463 = vmatpush3.msra.mxu0 %v1760_v5 }
 0x2b7   :  { %1464 = vmatprep.subr.mxu0 %v1677_v0 }
 0x2b8   :  { %1465 = vmatpush3.msra.mxu0 %v1773_v8 }
 0x2b9   :  { %1466 = vmatprep.subr.mxu0 %v1677_v0 }
 0x2ba   :  { %1467 = vmatpush3.msra.mxu0 %v1783_v10 }
 0x2bb   :  { %1468 = vmatprep.subr.mxu0 %v1677_v0 }
 0x2bc   :  { %1469 = vmatpush3.msra.mxu0 %v1792_v11 }
 0x2bd   :  { %1470 = vmatprep.subr.mxu0 %v1677_v0 }
 0x2be   :  { %1471 = vmatpush3.msra.mxu0 %v1801_v12 }
 0x2bf   :  { %1472 = vmatprep.subr.mxu0 %v1677_v0 }
 0x2c0   :  { %1473 = vmatpush3.msra.mxu0 %v1810_v13 }
 0x2c1   :  { %1474 = vmatprep.subr.mxu0 %v1677_v0 }
 0x2c2   :  { %1475 = vmatpush3.msra.mxu0 %v1819_v14 }
 0x2c3   :  { %1476 = vmatprep.subr.mxu0 %v1677_v0 }
 0x2c4   :  { %1477 = vmatpush3.msra.mxu0 %v1828_v15 }
 0x2c5   :  { %1478 = vmatprep.subr.mxu0 %v1677_v0 }
 0x2c6   :  { %1479 = vmatpush3.msra.mxu0 %v1837_v16 }
 0x2c7   :  { %1480 = vmatprep.subr.mxu0 %v1677_v0 }
 0x2c8   :  { %1481 = vmatpush3.msra.mxu0 %v1846_v17 }
 0x2c9   :  { %1482 = vmatprep.subr.mxu0 %v1677_v0 }
 0x2ca   :  { %1483 = vmatpush3.msra.mxu0 %v1855_v18 }
 0x2cb   :  { %1484 = vmatprep.subr.mxu0 %v1677_v0 }
 0x2cc   :  { %1485 = vmatpush3.msra.mxu0 %v1864_v19 }
 0x2cd   :  { %1486 = vmatprep.subr.mxu0 %v1677_v0 }
 0x2ce   :  { %1487 = vmatpush3.msra.mxu0 %v1873_v20 }
 0x2cf   :  { %1526 = vmatprep.subr.mxu0 %v1677_v0 }
 0x36f   :  { %v546_v62 = vpop.f32.mrf.mxu0 }
 0x370   :  { %v550_v63 = vadd.f32 %v546_v62, %v175_v61  ;;  %v970_v61 = vld [vmem:[%s2284_s7 + $0x18] sm:$0xff]  ;;  %v195_v62 = vadd.f32 %v2007_v41, %v1958_v28  ;;  %v967_v41 = vld [vmem:[%s2284_s7] sm:$0xff] }
 0x371   :  { %v1420_v4 = vpop.f32.mrf.mxu0 }
 0x372   :  { %1642 = vtanh.f32 %v550_v63 }
 0x37f   :  { %v1643_v6 = vpop.eup %1642 }
 0x380   :  { %v552_v9 = vsub.f32 %v1643_v6, %v477_v60 }
 0x382   :  { %v559_v21 = vmul.f32 %v2098_v7, %v552_v9 }
 0x384   :  { %v560_v22 = vadd.f32 %v559_v21, %v477_v60  ;;  %v971_v60 = vld [vmem:[%s2284_s7 + $0x20] sm:$0xff] }
 0x386   :  { %1454 = vmatmul.mubr.f32.vlgmr.msra.gmra.mxu1 %v560_v22 }
 0x387   :  { %1492 = vmatpush3.msra.mxu1 %v1738_v1  ;;  %1523 = vmatprep.mubr.msk.f32.mxu1 %vm1678_vm0, %v1677_v0 }
 0x388   :  { %1493 = vmatprep.subr.mxu1 %v1677_v0 }
 0x389   :  { %1494 = vmatpush3.msra.mxu1 %v1743_v2 }
 0x38a   :  { %1495 = vmatprep.subr.mxu1 %v1677_v0 }
 0x38b   :  { %1496 = vmatpush3.msra.mxu1 %v1750_v3 }
 0x38c   :  { %1497 = vmatprep.subr.mxu1 %v1677_v0 }
 0x38d   :  { %1498 = vmatpush3.msra.mxu1 %v1760_v5 }
 0x38e   :  { %1499 = vmatprep.subr.mxu1 %v1677_v0 }
 0x38f   :  { %1500 = vmatpush3.msra.mxu1 %v1773_v8 }
 0x390   :  { %1501 = vmatprep.subr.mxu1 %v1677_v0 }
 0x391   :  { %1502 = vmatpush3.msra.mxu1 %v1783_v10 }
 0x392   :  { %1503 = vmatprep.subr.mxu1 %v1677_v0 }
 0x393   :  { %1504 = vmatpush3.msra.mxu1 %v1792_v11 }
 0x394   :  { %1505 = vmatprep.subr.mxu1 %v1677_v0 }
 0x395   :  { %1506 = vmatpush3.msra.mxu1 %v1801_v12 }
 0x396   :  { %1507 = vmatprep.subr.mxu1 %v1677_v0 }
 0x397   :  { %1508 = vmatpush3.msra.mxu1 %v1810_v13 }
 0x398   :  { %1509 = vmatprep.subr.mxu1 %v1677_v0 }
 0x399   :  { %1510 = vmatpush3.msra.mxu1 %v1819_v14 }
 0x39a   :  { %1511 = vmatprep.subr.mxu1 %v1677_v0 }
 0x39b   :  { %1512 = vmatpush3.msra.mxu1 %v1828_v15 }
 0x39c   :  { %1513 = vmatprep.subr.mxu1 %v1677_v0 }
 0x39d   :  { %1514 = vmatpush3.msra.mxu1 %v1837_v16 }
 0x39e   :  { %1515 = vmatprep.subr.mxu1 %v1677_v0 }
 0x39f   :  { %1516 = vmatpush3.msra.mxu1 %v1846_v17 }
 0x3a0   :  { %1517 = vmatprep.subr.mxu1 %v1677_v0 }
 0x3a1   :  { %1518 = vmatpush3.msra.mxu1 %v1855_v18 }
 0x3a2   :  { %1519 = vmatprep.subr.mxu1 %v1677_v0 }
 0x3a3   :  { %1520 = vmatpush3.msra.mxu1 %v1864_v19 }
 0x3a4   :  { %1521 = vmatprep.subr.mxu1 %v1677_v0 }
 0x3a5   :  { %1522 = vmatpush3.msra.mxu1 %v1873_v20 }
 0x3a6   :  { %1561 = vmatprep.subr.mxu1 %v1677_v0 }
 0x446   :  { %v629_v24 = vpop.f32.mrf.mxu1 }
 0x447   :  { %v633_v25 = vadd.f32 %v629_v24, %v180_v23  ;;  %v969_v24 = vld [vmem:[%s2284_s7 + $0x10] sm:$0xff] }
 0x448   :  { %v1455_v26 = vpop.f32.mrf.mxu1 }
 0x449   :  { %1644 = vtanh.f32 %v633_v25 }
 0x456   :  { %v1645_v27 = vpop.eup %1644 }
 0x457   :  { %v635_v29 = vsub.f32 %v1645_v27, %v560_v22 }
 0x459   :  { %v636_v30 = vmul.f32 %v1964_v34, %v635_v29 }
 0x45b   :  { %v637_v31 = vadd.f32 %v636_v30, %v560_v22  ;;  %v1084_v30 = vld [vmem:[%s2285_s8] ss:$0 sm:$0xff] }
 0x45d   :  { %1489 = vmatmul.mubr.f32.vlgmr.msra.gmra.mxu0 %v637_v31 }
 0x45e   :  { %1527 = vmatpush3.msra.mxu0 %v1738_v1  ;;  %1558 = vmatprep.mubr.msk.f32.mxu0 %vm1678_vm0, %v1677_v0  ;;  %v185_v1 = vadd.f32 %v2003_v39, %v1958_v28  ;;  %v881_v39 = vld [vmem:[#allocation4 + $0x40] sm:$0xff] }
 0x45f   :  { %1528 = vmatprep.subr.mxu0 %v1677_v0 }
 0x460   :  { %1529 = vmatpush3.msra.mxu0 %v1743_v2 }
 0x461   :  { %1530 = vmatprep.subr.mxu0 %v1677_v0 }
 0x462   :  { %1531 = vmatpush3.msra.mxu0 %v1750_v3 }
 0x463   :  { %1532 = vmatprep.subr.mxu0 %v1677_v0 }
 0x464   :  { %1533 = vmatpush3.msra.mxu0 %v1760_v5 }
 0x465   :  { %1534 = vmatprep.subr.mxu0 %v1677_v0 }
 0x466   :  { %1535 = vmatpush3.msra.mxu0 %v1773_v8 }
 0x467   :  { %1536 = vmatprep.subr.mxu0 %v1677_v0 }
 0x468   :  { %1537 = vmatpush3.msra.mxu0 %v1783_v10 }
 0x469   :  { %1538 = vmatprep.subr.mxu0 %v1677_v0 }
 0x46a   :  { %1539 = vmatpush3.msra.mxu0 %v1792_v11 }
 0x46b   :  { %1540 = vmatprep.subr.mxu0 %v1677_v0 }
 0x46c   :  { %1541 = vmatpush3.msra.mxu0 %v1801_v12 }
 0x46d   :  { %1542 = vmatprep.subr.mxu0 %v1677_v0 }
 0x46e   :  { %1543 = vmatpush3.msra.mxu0 %v1810_v13  ;;  %v888_v13 = vld [vmem:[#allocation4 + $0x78] sm:$0xff] }
 0x46f   :  { %1544 = vmatprep.subr.mxu0 %v1677_v0 }
 0x470   :  { %1545 = vmatpush3.msra.mxu0 %v1819_v14  ;;  %v887_v14 = vld [vmem:[#allocation4 + $0x70] sm:$0xff] }
 0x471   :  { %1546 = vmatprep.subr.mxu0 %v1677_v0 }
 0x472   :  { %1547 = vmatpush3.msra.mxu0 %v1828_v15  ;;  %v886_v15 = vld [vmem:[#allocation4 + $0x68] sm:$0xff] }
 0x473   :  { %1548 = vmatprep.subr.mxu0 %v1677_v0 }
 0x474   :  { %1549 = vmatpush3.msra.mxu0 %v1837_v16  ;;  %v885_v16 = vld [vmem:[#allocation4 + $0x60] sm:$0xff] }
 0x475   :  { %1550 = vmatprep.subr.mxu0 %v1677_v0 }
 0x476   :  { %1551 = vmatpush3.msra.mxu0 %v1846_v17  ;;  %v190_v17 = vadd.f32 %v1958_v28, %v2009_v42  ;;  %v879_v42 = vld [vmem:[#allocation4 + $0x30] sm:$0xff]  ;;  %v968_v28 = vld [vmem:[%s2284_s7 + $0x8] sm:$0xff] }
 0x477   :  { %1552 = vmatprep.subr.mxu0 %v1677_v0 }
 0x478   :  { %1553 = vmatpush3.msra.mxu0 %v1855_v18 }
 0x479   :  { %1554 = vmatprep.subr.mxu0 %v1677_v0 }
 0x47a   :  { %1555 = vmatpush3.msra.mxu0 %v1864_v19 }
 0x47b   :  { %1556 = vmatprep.subr.mxu0 %v1677_v0 }
 0x47c   :  { %1557 = vmatpush3.msra.mxu0 %v1873_v20 }
 0x47d   :  { %1596 = vmatprep.subr.mxu0 %v1677_v0 }
 0x51d   :  { %v706_v2 = vpop.f32.mrf.mxu0 }
 0x51e   :  { %v710_v3 = vadd.f32 %v706_v2, %v185_v1 }
 0x51f   :  { %v1490_v5 = vpop.f32.mrf.mxu0 }
 0x520   :  { %1646 = vtanh.f32 %v710_v3 }
 0x52d   :  { %v1647_v8 = vpop.eup %1646 }
 0x52e   :  { %v712_v10 = vsub.f32 %v1647_v8, %v637_v31 }
 0x530   :  { %v713_v11 = vmul.f32 %v2015_v48, %v712_v10  ;;  %v873_v48 = vld [vmem:[#allocation4] sm:$0xff] }
 0x532   :  { %v714_v12 = vadd.f32 %v713_v11, %v637_v31 }
 0x534   :  { %1524 = vmatmul.mubr.f32.vlgmr.msra.gmra.mxu1 %v714_v12 }
 0x535   :  { %1593 = vmatprep.mubr.msk.f32.mxu1 %vm1678_vm0, %v1677_v0  ;;  %1562 = vmatpush3.msra.mxu1 %v888_v13 }
 0x536   :  { %1563 = vmatprep.subr.mxu1 %v1677_v0 }
 0x537   :  { %1564 = vmatpush3.msra.mxu1 %v887_v14 }
 0x538   :  { %1565 = vmatprep.subr.mxu1 %v1677_v0 }
 0x539   :  { %1566 = vmatpush3.msra.mxu1 %v886_v15 }
 0x53a   :  { %1567 = vmatprep.subr.mxu1 %v1677_v0 }
 0x53b   :  { %1568 = vmatpush3.msra.mxu1 %v885_v16 }
 0x53c   :  { %1569 = vmatprep.subr.mxu1 %v1677_v0 }
 0x53d   :  { %1570 = vmatpush3.msra.mxu1 %v884_v36 }
 0x53e   :  { %1571 = vmatprep.subr.mxu1 %v1677_v0 }
 0x53f   :  { %1572 = vmatpush3.msra.mxu1 %v883_v37 }
 0x540   :  { %1573 = vmatprep.subr.mxu1 %v1677_v0 }
 0x541   :  { %1574 = vmatpush3.msra.mxu1 %v882_v38 }
 0x542   :  { %1575 = vmatprep.subr.mxu1 %v1677_v0 }
 0x543   :  { %1576 = vmatpush3.msra.mxu1 %v881_v39 }
 0x544   :  { %1577 = vmatprep.subr.mxu1 %v1677_v0 }
 0x545   :  { %1578 = vmatpush3.msra.mxu1 %v880_v40 }
 0x546   :  { %1579 = vmatprep.subr.mxu1 %v1677_v0 }
 0x547   :  { %1580 = vmatpush3.msra.mxu1 %v879_v42 }
 0x548   :  { %1581 = vmatprep.subr.mxu1 %v1677_v0 }
 0x549   :  { %1582 = vmatpush3.msra.mxu1 %v878_v43 }
 0x54a   :  { %1583 = vmatprep.subr.mxu1 %v1677_v0 }
 0x54b   :  { %1584 = vmatpush3.msra.mxu1 %v877_v44 }
 0x54c   :  { %1585 = vmatprep.subr.mxu1 %v1677_v0 }
 0x54d   :  { %1586 = vmatpush3.msra.mxu1 %v876_v45 }
 0x54e   :  { %1587 = vmatprep.subr.mxu1 %v1677_v0 }
 0x54f   :  { %1588 = vmatpush3.msra.mxu1 %v875_v46 }
 0x550   :  { %1589 = vmatprep.subr.mxu1 %v1677_v0 }
 0x551   :  { %1590 = vmatpush3.msra.mxu1 %v874_v47 }
 0x552   :  { %1591 = vmatprep.subr.mxu1 %v1677_v0 }
 0x553   :  { %1592 = vmatpush3.msra.mxu1 %v873_v48 }
 0x5f4   :  { %v783_v18 = vpop.f32.mrf.mxu1 }
 0x5f5   :  { %v787_v19 = vadd.f32 %v783_v18, %v190_v17 }
 0x5f6   :  { %v1525_v20 = vpop.f32.mrf.mxu1 }
 0x5f7   :  { %1648 = vtanh.f32 %v787_v19 }
 0x604   :  { %v1649_v32 = vpop.eup %1648 }
 0x605   :  { %v789_v33 = vsub.f32 %v1649_v32, %v714_v12 }
 0x607   :  { %v790_v34 = vmul.f32 %v2056_v57, %v789_v33  ;;  %v974_v57 = vld [vmem:[%s2284_s7 + $0x38] sm:$0xff] }
 0x609   :  { %v2184_v35 = vadd.f32 %v790_v34, %v714_v12 }
 0x60b   :  { %1559 = vmatmul.mubr.f32.vlgmr.msra.gmra.mxu0 %v2184_v35 }
 0x60c   :  { %1628 = vmatprep.mubr.msk.f32.mxu0 %vm1678_vm0, %v1677_v0  ;;  %1597 = vmatpush3.msra.mxu0 %v982_v49 }
 0x60d   :  { %1598 = vmatprep.subr.mxu0 %v1677_v0 }
 0x60e   :  { %1599 = vmatpush3.msra.mxu0 %v981_v50 }
 0x60f   :  { %1600 = vmatprep.subr.mxu0 %v1677_v0 }
 0x610   :  { %1601 = vmatpush3.msra.mxu0 %v980_v51 }
 0x611   :  { %1602 = vmatprep.subr.mxu0 %v1677_v0 }
 0x612   :  { %1603 = vmatpush3.msra.mxu0 %v979_v52 }
 0x613   :  { %1604 = vmatprep.subr.mxu0 %v1677_v0 }
 0x614   :  { %1605 = vmatpush3.msra.mxu0 %v978_v53 }
 0x615   :  { %1606 = vmatprep.subr.mxu0 %v1677_v0 }
 0x616   :  { %1607 = vmatpush3.msra.mxu0 %v977_v54 }
 0x617   :  { %1608 = vmatprep.subr.mxu0 %v1677_v0 }
 0x618   :  { %1609 = vmatpush3.msra.mxu0 %v976_v55 }
 0x619   :  { %1610 = vmatprep.subr.mxu0 %v1677_v0 }
 0x61a   :  { %1611 = vmatpush3.msra.mxu0 %v975_v56 }
 0x61b   :  { %1612 = vmatprep.subr.mxu0 %v1677_v0 }
 0x61c   :  { %1613 = vmatpush3.msra.mxu0 %v974_v57 }
 0x61d   :  { %1614 = vmatprep.subr.mxu0 %v1677_v0 }
 0x61e   :  { %1615 = vmatpush3.msra.mxu0 %v973_v58 }
 0x61f   :  { %1616 = vmatprep.subr.mxu0 %v1677_v0 }
 0x620   :  { %1617 = vmatpush3.msra.mxu0 %v972_v59 }
 0x621   :  { %1618 = vmatprep.subr.mxu0 %v1677_v0 }
 0x622   :  { %1619 = vmatpush3.msra.mxu0 %v971_v60 }
 0x623   :  { %1620 = vmatprep.subr.mxu0 %v1677_v0 }
 0x624   :  { %1621 = vmatpush3.msra.mxu0 %v970_v61 }
 0x625   :  { %1622 = vmatprep.subr.mxu0 %v1677_v0 }
 0x626   :  { %1623 = vmatpush3.msra.mxu0 %v969_v24 }
 0x627   :  { %1624 = vmatprep.subr.mxu0 %v1677_v0 }
 0x628   :  { %1625 = vmatpush3.msra.mxu0 %v968_v28 }
 0x629   :  { %1626 = vmatprep.subr.mxu0 %v1677_v0 }
 0x62a   :  { %1627 = vmatpush3.msra.mxu0 %v967_v41 }
 0x6cb   :  { %v860_v63 = vpop.f32.mrf.mxu0 }
 0x6cc   :  { %v864_v4 = vadd.f32 %v860_v63, %v195_v62 }
 0x6cd   :  { %v1560_v6 = vpop.f32.mrf.mxu0 }
 0x6ce   :  { %1650 = vtanh.f32 %v864_v4 }
 0x6db   :  { %v1651_v9 = vpop.eup %1650 }
 0x6dc   :  { %v866_v21 = vsub.f32 %v1651_v9, %v2184_v35 }
 0x6de   :  { %v867_v22 = vmul.f32 %v2098_v7, %v866_v21  ;;  %v1083_v7 = vld [vmem:[%s2283_s6] ss:$0 sm:$0xff] }
 0x6e0   :  { %v868_v23 = vadd.f32 %v867_v22, %v2184_v35 }
 0x6e2   :  { %1594 = vmatmul.mubr.f32.vlgmr.msra.gmra.mxu1 %v868_v23 }
 0x7a2   :  { %v962_v25 = vpop.f32.mrf.mxu1 }
 0x7a3   :  { %v963_v26 = vadd.f32 %v1083_v7, %v962_v25 }
 0x7a4   :  { %v1595_v27 = vpop.f32.mrf.mxu1 }
 0x7a5   :  { %v966_v29 = vmax.f32 %v963_v26, 0.0 }
 0x7a7   :  { %1629 = vmatmul.mubr.f32.vlgmr.msra.gmra.mxu0 %v966_v29 }
 0x867   :  { %v1056_v31 = vpop.f32.mrf.mxu0 }
 0x868   :  { %v1057_v0 = vadd.f32 %v1084_v30, %v1056_v31 }
 0x869   :  { %v1630_v1 = vpop.f32.mrf.mxu0 }
 0x86a   :  { %1061 = vst.msk [vmem:[%s2286_s9] sm:$0xff] %vm1060_vm2, %v1057_v0 }
 0x86b   :  { %1066 = vsyncpa [#allocation5], 1 }

</bundles_post_ra>
